<compile_context>
chip_gen: v7x
topology: tpu7x:2x2x1
jax: 0.10.0
libtpu: 0.0.40
codegen_flags: <defaults>
</compile_context>

<pallas_src>
import functools

import jax
import jax.numpy as jnp
import numpy as np
from jax.experimental import pallas as pl
from jax.experimental.pallas import tpu as pltpu

LANES = 128
SUBLANES = 8


def _round_up(x, m):
    return ((x + m - 1) // m) * m


def policy_act_kernel(x_ref, w_ref, o_ref, *, dim_actions: int):
    # One fused MXU matmul.  Columns [0, A) are the actor logits, column A is
    # the critic value; bias is folded in via the constant-1 feature column.
    fused = jnp.dot(x_ref[...], w_ref[...],
                    preferred_element_type=jnp.float32)          # [BB, L]
    bb, lanes = fused.shape
    lane = jax.lax.broadcasted_iota(jnp.int32, (bb, lanes), 1)   # [BB, L]

    # Lane-dense logits: mask out the value column and the pad columns.
    neg = jnp.float32(-1e30)
    logits = jnp.where(lane < dim_actions, fused, neg)           # [BB, L]

    max_l = jnp.max(logits, axis=-1, keepdims=True)              # [BB, 1]
    z = jnp.sum(jnp.exp(logits - max_l), axis=-1, keepdims=True) # [BB, 1]
    # action == argmax(logits)  =>  log_softmax(logits)[action] == -log(z).
    alp = -jnp.log(z)                                            # [BB, 1]

    # argmax with first-index tie-break (matches jnp.argmax / torch mode()).
    is_max = logits >= max_l
    action = jnp.min(jnp.where(is_max, lane, lanes), axis=-1,
                     keepdims=True)                              # [BB, 1] i32

    value = fused[:, dim_actions:dim_actions + 1]                # [BB, 1]

    # Pack results into a single lane-dense f32 slab -> one unmasked store.
    slab = jnp.where(lane == 0, value,
                     jnp.where(lane == 1, action.astype(jnp.float32),
                               jnp.where(lane == 2, alp, jnp.float32(0.0))))
    o_ref[...] = slab


def policy_oracle_act(features, wa, ba, wc, bc, *, block_b=512):
    """Deterministic PolicyOracle.act head math.

    features: [B, H]; wa: [H, A] (pre-transposed); ba: [A]; wc: [H, 1]; bc: [1].
    Returns (value [B,1] f32, action [B,1] i32, action_log_probs [B,1] f32).
    """
    features = features.astype(jnp.float32)
    B, H = features.shape
    A = wa.shape[1]

    # ---- fuse actor + critic weights, fold biases, pad to HW-friendly dims --
    H_in = _round_up(H + 1, SUBLANES)          # +1 sublane row for folded bias
    L = _round_up(A + 1, LANES)                # [logits | value | zero-pad]

    w_fused = jnp.zeros((H_in, L), jnp.float32)
    w_fused = w_fused.at[:H, :A].set(wa.astype(jnp.float32))
    w_fused = w_fused.at[:H, A:A + 1].set(wc.astype(jnp.float32))
    w_fused = w_fused.at[H, :A].set(ba.astype(jnp.float32))
    w_fused = w_fused.at[H, A].set(bc.astype(jnp.float32)[0])

    # ---- batch tiling (grid over B, 'parallel' for megacore) ----------------
    b8 = _round_up(B, SUBLANES)
    bb = min(b8, block_b)                      # modest tile -> fits v7x VMEM
    B_pad = _round_up(b8, bb)

    x_aug = jnp.zeros((B_pad, H_in), jnp.float32)
    x_aug = x_aug.at[:B, :H].set(features)
    x_aug = x_aug.at[:B, H].set(1.0)           # constant-1 column (bias fold)

    grid = (B_pad // bb,)

    out = pl.pallas_call(
        functools.partial(policy_act_kernel, dim_actions=A),
        out_shape=jax.ShapeDtypeStruct((B_pad, L), jnp.float32),
        grid=grid,
        in_specs=[
            pl.BlockSpec((bb, H_in), lambda i: (i, 0)),     # feature rows, tiled
            pl.BlockSpec((H_in, L), lambda i: (0, 0)),      # fused weights, resident
        ],
        out_specs=pl.BlockSpec((bb, L), lambda i: (i, 0)),  # lane-dense slab
        compiler_params=pltpu.CompilerParams(
            dimension_semantics=("parallel",)),
        cost_estimate=pl.CostEstimate(
            flops=2 * B_pad * H_in * L,
            transcendentals=B_pad * (L + 1),
            bytes_accessed=4 * (B_pad * H_in + H_in * L + B_pad * L)),
    )(x_aug, w_fused)

    value = out[:B, 0:1]
    action = out[:B, 1:2].astype(jnp.int32)
    alp = out[:B, 2:3]
    return value, action, alp


def _reference(features, wa, ba, wc, bc):
    logits = features @ wa + ba[None, :]
    value = features @ wc + bc[None, :]
    logp = jax.nn.log_softmax(logits, axis=-1)
    action = jnp.argmax(logits, axis=-1, keepdims=True)
    alp = jnp.take_along_axis(logp, action, axis=-1)
    return value, action.astype(jnp.int32), alp


if __name__ == "__main__":
    B, H, A = 8, 32, 4          # batch, net.output_size (hidden), dim_actions

    key = jax.random.PRNGKey(0)
    k_feat, k_wa, k_wc = jax.random.split(key, 3)

    features = jax.random.normal(k_feat, (B, H), dtype=jnp.float32)

    # CategoricalNet linear: orthogonal-init stand-in (deterministic synthetic init)
    wa = jax.random.normal(k_wa, (H, A), dtype=jnp.float32) * 0.01
    ba = jnp.zeros((A,), dtype=jnp.float32)
    # CriticHead: Linear(H, 1), bias = 0
    wc = jax.random.normal(k_wc, (H, 1), dtype=jnp.float32) * (1.0 / np.sqrt(H))
    bc = jnp.zeros((1,), dtype=jnp.float32)

    value, action, alp = policy_oracle_act(features, wa, ba, wc, bc)
    jax.block_until_ready((value, action, alp))

    v_ref, a_ref, alp_ref = _reference(features, wa, ba, wc, bc)
    assert np.allclose(np.asarray(value), np.asarray(v_ref), atol=1e-5), "value mismatch"
    assert np.array_equal(np.asarray(action), np.asarray(a_ref)), "action mismatch"
    assert np.allclose(np.asarray(alp), np.asarray(alp_ref), atol=1e-5), "log_prob mismatch"

    print("KERNEL_OK")
</pallas_src>

<mosaic_0001>
module attributes {stable_mosaic.version = 11 : i64} {
  func.func @policy_act_kernel(%arg0: i32, %arg1: memref<8x40xf32, #tpu.memory_space<vmem>>, %arg2: memref<40x128xf32, #tpu.memory_space<vmem>>, %arg3: memref<8x128xf32, #tpu.memory_space<vmem>>) attributes {dimension_semantics = [#tpu.dimension_semantics<parallel>], iteration_bounds = array<i64: 1>, scalar_prefetch = 0 : i64, scratch_operands = 0 : i64, tpu.core_type = #tpu.core_type<tc>, window_params = [{transform_indices = @transform_0, window_bounds = array<i64: 8, 40>}, {pipeline_mode = #tpu.pipeline_mode<synchronous>, transform_indices = @transform_1, window_bounds = array<i64: 40, 128>}, {transform_indices = @transform_2, window_bounds = array<i64: 8, 128>}]} {
    %c0 = arith.constant 0 : index
    %c0_0 = arith.constant 0 : index
    %0 = vector.load %arg1[%c0, %c0_0] : memref<8x40xf32, #tpu.memory_space<vmem>>, vector<8x40xf32>
    %c0_1 = arith.constant 0 : index
    %c0_2 = arith.constant 0 : index
    %1 = vector.load %arg2[%c0_1, %c0_2] : memref<40x128xf32, #tpu.memory_space<vmem>>, vector<40x128xf32>
    %cst = arith.constant dense<0.000000e+00> : vector<8x128xf32>
    %2 = tpu.matmul %0, %1, %cst {dimension_numbers = #tpu.dot_dimension_numbers<[1], [0], [0], [1], [0, 0, 1, 1], [], []>} : vector<8x40xf32>, vector<40x128xf32>, vector<8x128xf32> -> vector<8x128xf32>
    %3 = tpu.iota {dimensions = array<i32: 1>} : vector<8x128xi32>
    %c4_i32 = arith.constant 4 : i32
    %4 = vector.broadcast %c4_i32 : i32 to vector<8x128xi32>
    %5 = arith.cmpi slt, %3, %4 : vector<8x128xi32>
    %cst_3 = arith.constant -1.000000e+30 : f32
    %6 = vector.broadcast %cst_3 : f32 to vector<8x128xf32>
    %7 = arith.select %5, %2, %6 : vector<8x128xi1>, vector<8x128xf32>
    %cst_4 = arith.constant dense<0xFF800000> : vector<8xf32>
    %8 = vector.multi_reduction <maximumf>, %7, %cst_4 [1] : vector<8x128xf32> to vector<8xf32>
    %9 = vector.shape_cast %8 : vector<8xf32> to vector<8x1xf32>
    %10 = vector.broadcast %9 : vector<8x1xf32> to vector<8x128xf32>
    %11 = arith.subf %7, %10 : vector<8x128xf32>
    %12 = math.exp %11 : vector<8x128xf32>
    %cst_5 = arith.constant dense<0.000000e+00> : vector<8xf32>
    %13 = vector.multi_reduction <add>, %12, %cst_5 [1] : vector<8x128xf32> to vector<8xf32>
    %14 = vector.shape_cast %13 : vector<8xf32> to vector<8x1xf32>
    %15 = math.log %14 : vector<8x1xf32>
    %cst_6 = arith.constant 0.000000e+00 : f32
    %16 = vector.broadcast %cst_6 : f32 to vector<8x1xf32>
    %17 = arith.subf %16, %15 : vector<8x1xf32>
    %18 = vector.broadcast %9 : vector<8x1xf32> to vector<8x128xf32>
    %19 = arith.cmpf oge, %7, %18 : vector<8x128xf32>
    %c128_i32 = arith.constant 128 : i32
    %20 = vector.broadcast %c128_i32 : i32 to vector<8x128xi32>
    %21 = arith.select %19, %3, %20 : vector<8x128xi1>, vector<8x128xi32>
    %cst_7 = arith.constant dense<2147483647> : vector<8xi32>
    %22 = vector.multi_reduction <minsi>, %21, %cst_7 [1] : vector<8x128xi32> to vector<8xi32>
    %23 = vector.shape_cast %22 : vector<8xi32> to vector<8x1xi32>
    %24 = vector.extract_strided_slice %2 {offsets = [0, 4], sizes = [8, 1], strides = [1, 1]} : vector<8x128xf32> to vector<8x1xf32>
    %c0_i32 = arith.constant 0 : i32
    %25 = vector.broadcast %c0_i32 : i32 to vector<8x128xi32>
    %26 = arith.cmpi eq, %3, %25 : vector<8x128xi32>
    %c1_i32 = arith.constant 1 : i32
    %27 = vector.broadcast %c1_i32 : i32 to vector<8x128xi32>
    %28 = arith.cmpi eq, %3, %27 : vector<8x128xi32>
    %29 = arith.sitofp %23 : vector<8x1xi32> to vector<8x1xf32>
    %c2_i32 = arith.constant 2 : i32
    %30 = vector.broadcast %c2_i32 : i32 to vector<8x128xi32>
    %31 = arith.cmpi eq, %3, %30 : vector<8x128xi32>
    %cst_8 = arith.constant 0.000000e+00 : f32
    %32 = vector.shape_cast %17 : vector<8x1xf32> to vector<8x1xf32>
    %33 = vector.broadcast %32 : vector<8x1xf32> to vector<8x128xf32>
    %34 = vector.broadcast %cst_8 : f32 to vector<8x128xf32>
    %35 = arith.select %31, %33, %34 : vector<8x128xi1>, vector<8x128xf32>
    %36 = vector.shape_cast %29 : vector<8x1xf32> to vector<8x1xf32>
    %37 = vector.broadcast %36 : vector<8x1xf32> to vector<8x128xf32>
    %38 = arith.select %28, %37, %35 : vector<8x128xi1>, vector<8x128xf32>
    %39 = vector.shape_cast %24 : vector<8x1xf32> to vector<8x1xf32>
    %40 = vector.broadcast %39 : vector<8x1xf32> to vector<8x128xf32>
    %41 = arith.select %26, %40, %38 : vector<8x128xi1>, vector<8x128xf32>
    %c0_9 = arith.constant 0 : index
    %c0_10 = arith.constant 0 : index
    %42 = vector.load %arg3[%c0_9, %c0_10] : memref<8x128xf32, #tpu.memory_space<vmem>>, vector<8x128xf32>
    tpu.vector_store %arg3[%c0_9, %c0_10], %41 {strides = array<i32>} : memref<8x128xf32, #tpu.memory_space<vmem>>, vector<8x128xf32>,
    return
  }
  func.func @transform_0(%arg0: i32) -> (i32, i32) {
    %c0_i32 = arith.constant 0 : i32
    %c0_i32_0 = arith.constant 0 : i32
    return %arg0, %c0_i32 : i32, i32
  }
  func.func @transform_1(%arg0: i32) -> (i32, i32) {
    %c0_i32 = arith.constant 0 : i32
    %c0_i32_0 = arith.constant 0 : i32
    %c0_i32_1 = arith.constant 0 : i32
    return %c0_i32, %c0_i32_0 : i32, i32
  }
  func.func @transform_2(%arg0: i32) -> (i32, i32) {
    %c0_i32 = arith.constant 0 : i32
    %c0_i32_0 = arith.constant 0 : i32
    return %arg0, %c0_i32 : i32, i32
  }
}

</mosaic_0001>

<bundles_post_ra>
// kernel: tpu_custom_call.1
= control target key start
LH: loop header
LB: loop body
LE: loop exit
PB: predicated region body
PF: predicated region fallthrough
CT: control target
= control target key end

     0   :  { %7 = vsyncpa [#allocation3], 0  ;;  %s356_s0 = inlined_call_operand.hbm [shape: f32[8,40], index: 0, kind: input, shape index: {}]   ;;  %s357_s1 = inlined_call_operand.hbm [shape: f32[40,128], index: 1, kind: input, shape index: {}]   ;;  %s358_s2 = inlined_call_operand.hbm [shape: f32[8,128], index: 2, kind: output, shape index: {}]  }
   0x1   :  { %8 = vsyncpa [#allocation6], 0 }
   0x2   :  { %9 = vsyncpa [#allocation4], 0  ;;  %s289_s9 = smov [#allocation2]   ;;  %s290_s11 = smov [#allocation5]  }
   0x3   :  { %s16_s10 = sshll.u32 %s289_s9, 4  ;;  %s25_s12 = sshll.u32 %s290_s11, 4  ;;  %s17_s10 = int_to_ptr.vmem [resolvable:$true] %s16_s10  ;;  %s313_s12 = int_to_ptr.vmem [resolvable:$true] %s25_s12 }
   0x4   :  { %s217_s15 = scalar_lea.hbm %s356_s0, 128 }
   0x5   :  { %p218_p0 = scmp.ne.s32.totalorder %s356_s0, %s217_s15  ;;  %p221_p1 = scmp.lt.u32.totalorder %s217_s15, %s356_s0 }
   0x7   :  { %p223_p2 = pnand %p221_p1, %p218_p0 }
   0x9   :  { %226 = shalt.err (!%p223_p2)
}
   0xa   :  { %s227_s20 = scalar_lea.vmem %s17_s10, 128  ;;  %p232_p4 = scmp.lt.s32.totalorder %s17_s10, %s17_s10 }
   0xb   :  { %p228_p3 = scmp.ne.s32.totalorder %s17_s10, %s227_s20  ;;  %p233_p5 = scmp.lt.s32.totalorder %s227_s20, %s227_s20 }
   0xd   :  { %p234_p6 = por %p233_p5, %p232_p4 }
   0xf   :  { %p235_p7 = pnand %p234_p6, %p228_p3 }
  0x11   :  { %238 = shalt.err (!%p235_p7)
}
  0x12   :  { %19 = dma.hbm_to_vmem [thread:$0]  %s356_s0, 128, %s17_s10, [#allocation3]  }
  0x13   :  { %s239_s25 = scalar_lea.hbm %s357_s1, 640 }
  0x14   :  { %p240_p8 = scmp.ne.s32.totalorder %s357_s1, %s239_s25  ;;  %p243_p9 = scmp.lt.u32.totalorder %s239_s25, %s357_s1 }
  0x16   :  { %p245_p10 = pnand %p243_p9, %p240_p8 }
  0x18   :  { %248 = shalt.err (!%p245_p10)
}
  0x19   :  { %s249_s30 = scalar_lea.vmem %s313_s12, 640  ;;  %p254_p12 = scmp.lt.s32.totalorder %s313_s12, %s313_s12 }
  0x1a   :  { %p250_p11 = scmp.ne.s32.totalorder %s313_s12, %s249_s30  ;;  %p255_p13 = scmp.lt.s32.totalorder %s249_s30, %s249_s30 }
  0x1c   :  { %p256_p0 = por %p255_p13, %p254_p12 }
  0x1e   :  { %p257_p1 = pnand %p256_p0, %p250_p11 }
  0x20   :  { %260 = shalt.err (!%p257_p1)
}
  0x21   :  { %s291_s0 = smov 128   ;;  %s292_s3 = smov 8  }
  0x22   :  { %31 = dma.hbm_to_vmem [thread:$0]  %s357_s1, 640, %s313_s12, [#allocation6], %s291_s0, %s291_s0, %s292_s3  }
  0x23   :  { %283 = dma.done.wait [#allocation3], 128  }
  0x24   :  { %284 = vsyncadd [#allocation3], 4294967168 }
  0x25   :  { %285 = dma.done.wait [#allocation6], 640  }
  0x26   :  { %286 = vsyncadd [#allocation6], 4294966656  ;;  %v293_v0 = vmov 0.0|0.0   ;;  %vm294_vm0 = vmmov 0   ;;  %v295_v1 = vmov 0.0   ;;  %v39_v2 = vld [vmem:[#allocation5] sm:$0xff]  ;;  %v118_v10 = vlaneseq }
  0x27   :  { %197 = vmatprep.subr.bf16.mxu0 %v293_v0  ;;  %194 = vmatprep.mubr.msk.f32.mxu0 %vm294_vm0, %v295_v1  ;;  %v40_v3 = vld [vmem:[#allocation5 + $0x8] sm:$0xff]  ;;  %v41_v4 = vld [vmem:[#allocation5 + $0x10] sm:$0xff]  ;;  %v42_v6 = vld [vmem:[#allocation5 + $0x18] sm:$0xff]  ;;  %vm44_vm1 = vcmask 326656   ;;  %v296_v15 = vmov 4   ;;  %s297_s1 = smov [#allocation7]  }
  0x28   :  { %v198_v5 = vpack.c.bf16 %v40_v3, %v39_v2  ;;  %v201_v7 = vpack.c.bf16 %v42_v6, %v41_v4  ;;  %v43_v8 = vld [vmem:[#allocation5 + $0x20] sm:$0xff]  ;;  %v38_v9 = vld [vmem:[#allocation2] sm:$0xff]  ;;  %v119_v11 = vand.u32 127, %v118_v10  ;;  %212 = vset.pattern.permute.xlu0 %v296_v15  ;;  %s167_s6 = sshll.u32 %s297_s1, 4  ;;  %s168_s6 = int_to_ptr.vmem [resolvable:$true] %s167_s6 }
  0x29   :  { %s261_s7 = scalar_lea.vmem %s168_s6, 128  ;;  %p266_p3 = scmp.lt.s32.totalorder %s168_s6, %s168_s6 }
  0x2a   :  { %199 = vmatpush3.bf16.msra.mxu0 %v198_v5  ;;  %vm120_vm2 = vcmp.lt.s32.totalorder %v119_v11, 4  ;;  %vm151_vm5 = vcmp.eq.s32.totalorder %v119_v11, 2  ;;  %vm149_vm6 = vcmp.eq.s32.totalorder %v119_v11, 1  ;;  %vm148_vm7 = vcmp.eq.s32.totalorder %v119_v11, 0  ;;  %p262_p2 = scmp.ne.s32.totalorder %s168_s6, %s261_s7  ;;  %p267_p4 = scmp.lt.s32.totalorder %s261_s7, %s261_s7 }
  0x2b   :  { %200 = vmatprep.subr.bf16.mxu0 %v293_v0 }
  0x2c   :  { %p268_p5 = por %p267_p4, %p266_p3 }
  0x2e   :  { %202 = vmatpush3.bf16.msra.mxu0 %v201_v7  ;;  %p269_p6 = pnand %p268_p5, %p262_p2 }
  0x2f   :  { %192 = vmatprep.subr.mxu0 %v295_v1 }
  0x32   :  { %193 = vmatpush3.msra.mxu0 %v43_v8 }
  0x33   :  { %195 = vmatmul.mubr.msk.f32.vlgmr.msra.gmra.mrb[0].mxu0 %vm44_vm1, %v38_v9 }
 0x106   :  { %v114_v12 = vpop.f32.mrb[0].mxu0 }
 0x107   :  { %v196_v13 = vpop.f32.mrb[1].mxu0  ;;  %v121_v14 = vsel %vm120_vm2, %v114_v12, -1e+30 }
 0x108   :  { %122 = vmax.xlane.f32.xlu0 %v121_v14 }
 0x195   :  { %v123_v16 = vpop.xlane.xlu0 %122 }
 0x196   :  { %v124_v17 = vsub.f32 %v121_v14, %v123_v16  ;;  %vm132_vm3 = vcmp.ge.f32.partialorder %v121_v14, %v123_v16 }
 0x197   :  { %v133_v18 = vsel %vm132_vm3, %v119_v11, 128 }
 0x198   :  { %v125_v19 = vmul.f32 1.442695, %v124_v17  ;;  %v135_v20 = vshra.s32 %v133_v18, 16  ;;  %v134_v23 = vand.u32 65535, %v133_v18 }
 0x19a   :  { %v137_v21 = vcvt.s32.f32 %v135_v20  ;;  %213 = vpow2.f32 %v125_v19  ;;  %v136_v25 = vcvt.s32.f32 %v134_v23 }
 0x19c   :  { %138 = vmin.xlane.f32.xlu0 %v137_v21 }
 0x1a4   :  { %v214_v22 = vpop.eup %213 }
 0x1a5   :  { %127 = vadd.xlane.f32.xlu1 %v214_v22 }
 0x1b2   :  { %156 = vperm.xlu0 %212, %v114_v12  }
 0x229   :  { %v139_v24 = vpop.xlane.xlu0 %138 }
 0x22a   :  { %vm140_vm4 = vcmp.eq.f32.partialorder %v137_v21, %v139_v24  ;;  %v145_v29 = vcvt.f32.s32 %v139_v24 }
 0x22b   :  { %v141_v26 = vsel %vm140_vm4, %v136_v25, inf }
 0x22c   :  { %142 = vmin.xlane.f32.xlu1 %v141_v26  ;;  %v146_v32 = vshll.u32 %v145_v29, 16 }
 0x231   :  { %v157_v38 = vpop.permute.xlu0 %156 }
 0x232   :  { %v128_v27 = vpop.xlane.xlu1 %127 }
 0x233   :  { %215 = vlog2.f32 %v128_v27 }
 0x23d   :  { %v216_v28 = vpop.eup %215 }
 0x23e   :  { %v130_v30 = vmul.f32 0.6931472, %v216_v28 }
 0x240   :  { %v131_v34 = vsub.f32 0.0, %v130_v30 }
 0x242   :  { %v152_v37 = vsel %vm151_vm5, %v131_v34, 0.0 }
 0x2b9   :  { %v143_v31 = vpop.xlane.xlu1 %142 }
 0x2ba   :  { %v144_v33 = vcvt.f32.s32 %v143_v31 }
 0x2bc   :  { %v147_v35 = vadd.s32 %v146_v32, %v144_v33 }
 0x2be   :  { %v150_v36 = vcvt.s32.f32 %v147_v35 }
 0x2c0   :  { %v153_v39 = vsel %vm149_vm6, %v150_v36, %v152_v37 }
 0x2c1   :  { %v159_v40 = vsel %vm148_vm7, %v157_v38, %v153_v39 }
 0x2c2   :  { %160 = vst [vmem:[#allocation7] sm:$0xff] %v159_v40 }
 0x2c3   :  { %272 = shalt.err (!%p269_p6)
}
 0x2c4   :  { %s273_s10 = scalar_lea.hbm %s358_s2, 128 }
 0x2c5   :  { %p274_p7 = scmp.ne.s32.totalorder %s358_s2, %s273_s10  ;;  %p277_p8 = scmp.lt.u32.totalorder %s273_s10, %s358_s2 }
 0x2c7   :  { %p279_p9 = pnand %p277_p8, %p274_p7 }
 0x2c9   :  { %282 = shalt.err (!%p279_p9)
}
 0x2ca   :  { %170 = dma.vmem_to_hbm [thread:$0]  %s168_s6, 128, %s358_s2, [#allocation4]  }
 0x2cb   :  { %287 = dma.done.wait [#allocation4], 128  }
 0x2cc   :  { %288 = vsyncadd [#allocation4], 4294967168 }
 0x2cd   :  { %174 = vsyncpa [#allocation3], 1 }
 0x2ce   :  { %175 = vsyncpa [#allocation6], 1 }
 0x2cf   :  { %176 = vsyncpa [#allocation4], 1 }

</bundles_post_ra>
